<compile_context>
chip_gen: v7x
topology: tpu7x:2x2x1
jax: 0.10.0
libtpu: 0.0.40
codegen_flags: <defaults>
</compile_context>

<pallas_src>
import functools

import jax
import jax.numpy as jnp
from jax.experimental import pallas as pl
from jax.experimental.pallas import tpu as pltpu


# ----------------------------------------------------------------------------
# Pallas kernel
# ----------------------------------------------------------------------------
def _seghead_kernel(n_hidden, mxu_dtype, precision, *refs):
    """refs = (x_ref, w1, b1, ..., w_h, b_h, w_out, b_out, o_ref).

    x_ref block : (1, ft_dim,      tile_s)   channels on sublanes, space on lanes
    w_i         : (ft_dim, ft_dim)           PyTorch (out, in) layout
    b_i         : (ft_dim, 1)                f32
    w_out       : (num_classes, ft_dim)
    b_out       : (num_classes, 1)           f32
    o_ref block : (1, num_classes, tile_s)   lane-dense output
    """
    x_ref = refs[0]
    o_ref = refs[-1]
    param_refs = refs[1:-1]

    compute_dt = mxu_dtype if mxu_dtype is not None else x_ref.dtype
    h = x_ref[0]                                   # (ft_dim, tile_s)
    if h.dtype != compute_dt:
        h = h.astype(compute_dt)                   # in-kernel MXU-input cast

    # Hidden 1x1x1 conv layers: h = relu(W @ h + b); accumulate in f32.
    # TODO(synk): stack hidden weights as (L, ft_dim, ft_dim) + lax.fori_loop
    #             if conv_layers ever grows large (irrelevant at 2).
    for i in range(n_hidden):
        w = param_refs[2 * i][...]                 # (ft_dim, ft_dim)
        b = param_refs[2 * i + 1][...]             # (ft_dim, 1), f32
        acc = jnp.dot(w, h, preferred_element_type=jnp.float32,
                      precision=precision)
        acc = jnp.maximum(acc + b, 0.0)            # bias + ReLU in f32
        h = acc.astype(compute_dt)

    # Final projection to num_classes (no activation).
    w_out = param_refs[2 * n_hidden][...]          # (num_classes, ft_dim)
    b_out = param_refs[2 * n_hidden + 1][...]      # (num_classes, 1), f32
    out = jnp.dot(w_out, h, preferred_element_type=jnp.float32,
                  precision=precision) + b_out

    o_ref[0] = out.astype(o_ref.dtype)


# ----------------------------------------------------------------------------
# Tile-size heuristic
# ----------------------------------------------------------------------------
def _auto_tile_s(S, N, ft_dim, num_classes, in_itemsize, out_itemsize):
    """~2 MiB of input per grid step, VMEM-safe on v7x (64 MiB), and keep
    N * cdiv(S, tile) >= ~8 grid steps so the pipeline has work to overlap."""
    tile = (2 << 20) // (ft_dim * in_itemsize)            # ~2 MiB input block
    per_lane = (2 * ft_dim * in_itemsize                  # dbl-buffered input
                + 2 * num_classes * out_itemsize          # dbl-buffered output
                + 4 * ft_dim * 4)                         # f32 body intermediates
    tile = min(tile, (24 << 20) // per_lane)              # <= ~24 MiB per step
    steps_along_s = max(1, -(-8 // N))                    # want >= 8 total steps
    tile = min(tile, -(-S // steps_along_s))
    tile = min(tile, -(-S // 128) * 128)                  # no point exceeding S
    return max(128, (tile // 128) * 128)


# ----------------------------------------------------------------------------
# Wrapper
# ----------------------------------------------------------------------------
def seg_head_forward(mask_features, params, num_classes, *,
                     tile_s=None, mxu_dtype=None, out_dtype=jnp.float32,
                     precision=None):
    """mask_features: (N, ft_dim, D, H, W), NCDHW like PyTorch.

    params: list of (w, b) in PyTorch layout:
            w : (out_dim, in_dim)   (Conv3d weight with the 1x1x1 squeezed)
            b : (out_dim,) or (out_dim, 1)
    mxu_dtype : optional dtype (e.g. jnp.bfloat16) for MXU inputs; the cast is
            done *inside* the kernel.  Accumulation / bias / ReLU stay f32.
    out_dtype : output storage dtype (f32 matches PyTorch; bf16 halves writes).
    Returns (N, num_classes, D, H, W) in out_dtype.
    """
    N, C, D, H, W = mask_features.shape
    ft_dim = C
    n_hidden = len(params) - 1
    S = D * H * W

    in_dtype = mask_features.dtype
    in_itemsize = jnp.dtype(in_dtype).itemsize
    out_itemsize = jnp.dtype(out_dtype).itemsize
    w_dtype = mxu_dtype if mxu_dtype is not None else in_dtype

    # NCDHW -> (N, C, S): contiguous reshape only; no transpose / cast / pad.
    x = mask_features.reshape(N, C, S)

    if tile_s is None:
        tile_s = _auto_tile_s(S, N, ft_dim, num_classes, in_itemsize,
                              out_itemsize)
    assert tile_s % 128 == 0, "tile_s must be a multiple of 128 (lane width)"
    n_s = pl.cdiv(S, tile_s)

    flat_params = []
    param_specs = []
    for (w, b) in params:
        assert w.shape[1] == ft_dim, w.shape
        flat_params.append(w.astype(w_dtype))                        # (out, in)
        flat_params.append(b.reshape(-1, 1).astype(jnp.float32))     # (out, 1)
        param_specs.append(pl.BlockSpec(flat_params[-2].shape,
                                        lambda n, s: (0, 0)))
        param_specs.append(pl.BlockSpec(flat_params[-1].shape,
                                        lambda n, s: (0, 0)))

    # VMEM footprint per grid step (double-buffered in/out blocks + f32 body
    # intermediates + resident params) -> raise scoped VMEM accordingly,
    # capped well under v7x's 64 MiB physical VMEM.
    param_bytes = int(sum(int(p.size) * p.dtype.itemsize for p in flat_params))
    step_bytes = (2 * ft_dim * tile_s * in_itemsize
                  + 2 * num_classes * tile_s * out_itemsize
                  + 4 * ft_dim * tile_s * 4
                  + param_bytes)
    vmem_limit = int(min(48 << 20, max(32 << 20, 2 * step_bytes)))

    flops = 2 * N * S * ft_dim * (n_hidden * ft_dim + num_classes)
    bytes_accessed = (N * S * ft_dim * in_itemsize
                      + param_bytes
                      + N * S * num_classes * out_itemsize)

    out = pl.pallas_call(
        functools.partial(_seghead_kernel, n_hidden, mxu_dtype, precision),
        out_shape=jax.ShapeDtypeStruct((N, num_classes, S), out_dtype),
        grid_spec=pltpu.PrefetchScalarGridSpec(
            num_scalar_prefetch=0,
            grid=(N, n_s),
            in_specs=[pl.BlockSpec((1, ft_dim, tile_s),
                                   lambda n, s: (n, 0, s))] + param_specs,
            out_specs=pl.BlockSpec((1, num_classes, tile_s),
                                   lambda n, s: (n, 0, s)),
        ),
        compiler_params=pltpu.CompilerParams(
            dimension_semantics=("parallel", "parallel"),
            vmem_limit_bytes=vmem_limit),
        cost_estimate=pl.CostEstimate(
            flops=int(flops),
            transcendentals=0,
            bytes_accessed=int(bytes_accessed)),
    )(x, *flat_params)

    return out.reshape(N, num_classes, D, H, W)


# ----------------------------------------------------------------------------
# Deterministic parameter init (PyTorch Conv3d layout: weight (out, in), bias (out,))
# ----------------------------------------------------------------------------
def init_params(key, ft_dim, num_classes, conv_layers):
    params = []
    dims = [(ft_dim, ft_dim)] * conv_layers + [(num_classes, ft_dim)]
    for (d_out, d_in) in dims:
        key, kw, kb = jax.random.split(key, 3)
        bound = 1.0 / jnp.sqrt(d_in)
        w = jax.random.uniform(kw, (d_out, d_in), jnp.float32, -bound, bound)
        b = jax.random.uniform(kb, (d_out,), jnp.float32, -bound, bound)
        params.append((w, b))
    return params


def reference_forward(mask_features, params):
    """Pure-JAX reference (per-voxel MLP over channel dim), f32."""
    N, C, D, H, W = mask_features.shape
    h = mask_features.reshape(N, C, -1).astype(jnp.float32)       # (N, C, S)
    for i, (w, b) in enumerate(params):
        h = jnp.einsum("oc,ncs->nos", w, h) + b.reshape(1, -1, 1)
        if i < len(params) - 1:
            h = jnp.maximum(h, 0.0)
    return h.reshape(N, -1, D, H, W)                              # NCDHW


# ----------------------------------------------------------------------------
if __name__ == "__main__":
    # Config consistent with the module: cfg.ft_dim, cfg.conv_layers, num_classes.
    batch = 2
    ft_dim = 32
    conv_layers = 2
    num_classes = 4
    D = H = W = 16          # S = 4096

    key = jax.random.PRNGKey(0)
    key, kx = jax.random.split(key)
    mask_features = jax.random.normal(
        kx, (batch, ft_dim, D, H, W), dtype=jnp.float32)
    params = init_params(key, ft_dim, num_classes, conv_layers)

    ref = reference_forward(mask_features, params)

    # f32 path (PyTorch module semantics).
    out = jax.block_until_ready(
        seg_head_forward(mask_features, params, num_classes))
    assert out.shape == (batch, num_classes, D, H, W), out.shape
    err = float(jnp.max(jnp.abs(out - ref)))
    assert err < 2e-3, f"f32 max abs err {err}"

    # In-kernel bf16 MXU-input path (no wrapper-side cast pass; f32 accumulate).
    out_bf = jax.block_until_ready(
        seg_head_forward(mask_features, params, num_classes,
                         mxu_dtype=jnp.bfloat16))
    err_bf = float(jnp.max(jnp.abs(out_bf - ref)))
    assert err_bf < 1e-1, f"bf16-mxu max abs err {err_bf}"

    # Non-divisible spatial size: exercises the ragged last block (no pad/slice).
    D2, H2, W2 = 5, 6, 7    # S = 210, not a multiple of 128
    key, kx2 = jax.random.split(key)
    mf2 = jax.random.normal(kx2, (batch, ft_dim, D2, H2, W2), dtype=jnp.float32)
    out2 = jax.block_until_ready(
        seg_head_forward(mf2, params, num_classes))
    ref2 = reference_forward(mf2, params)
    assert out2.shape == (batch, num_classes, D2, H2, W2), out2.shape
    err2 = float(jnp.max(jnp.abs(out2 - ref2)))
    assert err2 < 2e-3, f"ragged-shape max abs err {err2}"

    # bf16 output stream option (halves the output write traffic).
    out3 = jax.block_until_ready(
        seg_head_forward(mask_features, params, num_classes,
                         out_dtype=jnp.bfloat16))
    assert out3.dtype == jnp.bfloat16
    err3 = float(jnp.max(jnp.abs(out3.astype(jnp.float32) - ref)))
    assert err3 < 1e-1, f"bf16-out max abs err {err3}"

    print("KERNEL_OK")
</pallas_src>

<mosaic_0001>
module attributes {stable_mosaic.version = 11 : i64} {
  func.func @_seghead_kernel(%arg0: i32, %arg1: i32, %arg2: memref<1x32x1024xf32, #tpu.memory_space<vmem>>, %arg3: memref<32x32xf32, #tpu.memory_space<vmem>>, %arg4: memref<32x1xf32, #tpu.memory_space<vmem>>, %arg5: memref<32x32xf32, #tpu.memory_space<vmem>>, %arg6: memref<32x1xf32, #tpu.memory_space<vmem>>, %arg7: memref<4x32xf32, #tpu.memory_space<vmem>>, %arg8: memref<4x1xf32, #tpu.memory_space<vmem>>, %arg9: memref<1x4x1024xf32, #tpu.memory_space<vmem>>) attributes {dimension_semantics = [#tpu.dimension_semantics<parallel>, #tpu.dimension_semantics<parallel>], iteration_bounds = array<i64: 2, 4>, scalar_prefetch = 0 : i64, scratch_operands = 0 : i64, tpu.core_type = #tpu.core_type<tc>, window_params = [{transform_indices = @transform_0, window_bounds = array<i64: 1, 32, 1024>}, {pipeline_mode = #tpu.pipeline_mode<synchronous>, transform_indices = @transform_1, window_bounds = array<i64: 32, 32>}, {pipeline_mode = #tpu.pipeline_mode<synchronous>, transform_indices = @transform_2, window_bounds = array<i64: 32, 1>}, {pipeline_mode = #tpu.pipeline_mode<synchronous>, transform_indices = @transform_3, window_bounds = array<i64: 32, 32>}, {pipeline_mode = #tpu.pipeline_mode<synchronous>, transform_indices = @transform_4, window_bounds = array<i64: 32, 1>}, {pipeline_mode = #tpu.pipeline_mode<synchronous>, transform_indices = @transform_5, window_bounds = array<i64: 4, 32>}, {pipeline_mode = #tpu.pipeline_mode<synchronous>, transform_indices = @transform_6, window_bounds = array<i64: 4, 1>}, {transform_indices = @transform_7, window_bounds = array<i64: 1, 4, 1024>}]} {
    %c0 = arith.constant 0 : index
    %c0_0 = arith.constant 0 : index
    %c0_1 = arith.constant 0 : index
    %0 = vector.load %arg2[%c0, %c0_0, %c0_1] : memref<1x32x1024xf32, #tpu.memory_space<vmem>>, vector<1x32x1024xf32>
    %1 = vector.shape_cast %0 : vector<1x32x1024xf32> to vector<32x1024xf32>
    %c0_2 = arith.constant 0 : index
    %c0_3 = arith.constant 0 : index
    %2 = vector.load %arg3[%c0_2, %c0_3] : memref<32x32xf32, #tpu.memory_space<vmem>>, vector<32x32xf32>
    %c0_4 = arith.constant 0 : index
    %c0_5 = arith.constant 0 : index
    %3 = vector.load %arg4[%c0_4, %c0_5] : memref<32x1xf32, #tpu.memory_space<vmem>>, vector<32x1xf32>
    %cst = arith.constant dense<0.000000e+00> : vector<32x1024xf32>
    %4 = tpu.matmul %2, %1, %cst {dimension_numbers = #tpu.dot_dimension_numbers<[1], [0], [0], [1], [0, 0, 1, 1], [], []>} : vector<32x32xf32>, vector<32x1024xf32>, vector<32x1024xf32> -> vector<32x1024xf32>
    %5 = vector.broadcast %3 : vector<32x1xf32> to vector<32x1024xf32>
    %6 = arith.addf %4, %5 : vector<32x1024xf32>
    %cst_6 = arith.constant 0.000000e+00 : f32
    %7 = vector.broadcast %cst_6 : f32 to vector<32x1024xf32>
    %8 = arith.maximumf %6, %7 : vector<32x1024xf32>
    %c0_7 = arith.constant 0 : index
    %c0_8 = arith.constant 0 : index
    %9 = vector.load %arg5[%c0_7, %c0_8] : memref<32x32xf32, #tpu.memory_space<vmem>>, vector<32x32xf32>
    %c0_9 = arith.constant 0 : index
    %c0_10 = arith.constant 0 : index
    %10 = vector.load %arg6[%c0_9, %c0_10] : memref<32x1xf32, #tpu.memory_space<vmem>>, vector<32x1xf32>
    %cst_11 = arith.constant dense<0.000000e+00> : vector<32x1024xf32>
    %11 = tpu.matmul %9, %8, %cst_11 {dimension_numbers = #tpu.dot_dimension_numbers<[1], [0], [0], [1], [0, 0, 1, 1], [], []>} : vector<32x32xf32>, vector<32x1024xf32>, vector<32x1024xf32> -> vector<32x1024xf32>
    %12 = vector.broadcast %10 : vector<32x1xf32> to vector<32x1024xf32>
    %13 = arith.addf %11, %12 : vector<32x1024xf32>
    %cst_12 = arith.constant 0.000000e+00 : f32
    %14 = vector.broadcast %cst_12 : f32 to vector<32x1024xf32>
    %15 = arith.maximumf %13, %14 : vector<32x1024xf32>
    %c0_13 = arith.constant 0 : index
    %c0_14 = arith.constant 0 : index
    %16 = vector.load %arg7[%c0_13, %c0_14] : memref<4x32xf32, #tpu.memory_space<vmem>>, vector<4x32xf32>
    %c0_15 = arith.constant 0 : index
    %c0_16 = arith.constant 0 : index
    %17 = vector.load %arg8[%c0_15, %c0_16] : memref<4x1xf32, #tpu.memory_space<vmem>>, vector<4x1xf32>
    %cst_17 = arith.constant dense<0.000000e+00> : vector<4x1024xf32>
    %18 = tpu.matmul %16, %15, %cst_17 {dimension_numbers = #tpu.dot_dimension_numbers<[1], [0], [0], [1], [0, 0, 1, 1], [], []>} : vector<4x32xf32>, vector<32x1024xf32>, vector<4x1024xf32> -> vector<4x1024xf32>
    %19 = vector.broadcast %17 : vector<4x1xf32> to vector<4x1024xf32>
    %20 = arith.addf %18, %19 : vector<4x1024xf32>
    %c0_18 = arith.constant 0 : index
    %c0_19 = arith.constant 0 : index
    %c0_20 = arith.constant 0 : index
    %21 = vector.load %arg9[%c0_18, %c0_19, %c0_20] : memref<1x4x1024xf32, #tpu.memory_space<vmem>>, vector<1x4x1024xf32>
    %22 = vector.shape_cast %21 : vector<1x4x1024xf32> to vector<4x1024xf32>
    %23 = vector.shape_cast %20 : vector<4x1024xf32> to vector<1x4x1024xf32>
    tpu.vector_store %arg9[%c0_18, %c0_19, %c0_20], %23 {strides = array<i32>} : memref<1x4x1024xf32, #tpu.memory_space<vmem>>, vector<1x4x1024xf32>,
    return
  }
  func.func @transform_0(%arg0: i32, %arg1: i32) -> (i32, i32, i32) {
    %c0_i32 = arith.constant 0 : i32
    %c0_i32_0 = arith.constant 0 : i32
    return %arg0, %c0_i32, %arg1 : i32, i32, i32
  }
  func.func @transform_1(%arg0: i32, %arg1: i32) -> (i32, i32) {
    %c0_i32 = arith.constant 0 : i32
    %c0_i32_0 = arith.constant 0 : i32
    %c0_i32_1 = arith.constant 0 : i32
    return %c0_i32, %c0_i32_0 : i32, i32
  }
  func.func @transform_2(%arg0: i32, %arg1: i32) -> (i32, i32) {
    %c0_i32 = arith.constant 0 : i32
    %c0_i32_0 = arith.constant 0 : i32
    %c0_i32_1 = arith.constant 0 : i32
    return %c0_i32, %c0_i32_0 : i32, i32
  }
  func.func @transform_3(%arg0: i32, %arg1: i32) -> (i32, i32) {
    %c0_i32 = arith.constant 0 : i32
    %c0_i32_0 = arith.constant 0 : i32
    %c0_i32_1 = arith.constant 0 : i32
    return %c0_i32, %c0_i32_0 : i32, i32
  }
  func.func @transform_4(%arg0: i32, %arg1: i32) -> (i32, i32) {
    %c0_i32 = arith.constant 0 : i32
    %c0_i32_0 = arith.constant 0 : i32
    %c0_i32_1 = arith.constant 0 : i32
    return %c0_i32, %c0_i32_0 : i32, i32
  }
  func.func @transform_5(%arg0: i32, %arg1: i32) -> (i32, i32) {
    %c0_i32 = arith.constant 0 : i32
    %c0_i32_0 = arith.constant 0 : i32
    %c0_i32_1 = arith.constant 0 : i32
    return %c0_i32, %c0_i32_0 : i32, i32
  }
  func.func @transform_6(%arg0: i32, %arg1: i32) -> (i32, i32) {
    %c0_i32 = arith.constant 0 : i32
    %c0_i32_0 = arith.constant 0 : i32
    %c0_i32_1 = arith.constant 0 : i32
    return %c0_i32, %c0_i32_0 : i32, i32
  }
  func.func @transform_7(%arg0: i32, %arg1: i32) -> (i32, i32, i32) {
    %c0_i32 = arith.constant 0 : i32
    %c0_i32_0 = arith.constant 0 : i32
    return %arg0, %c0_i32, %arg1 : i32, i32, i32
  }
}

</mosaic_0001>

<bundles_post_ra>
// kernel: tpu_custom_call.1
= control target key start
LH: loop header
LB: loop body
LE: loop exit
PB: predicated region body
PF: predicated region fallthrough
CT: control target
= control target key end

     0   :  { %s2477_s0 = inlined_call_operand.hbm [shape: f32[2,32,4096], index: 0, kind: input, shape index: {}]   ;;  %s2478_s1 = inlined_call_operand.vmem [shape: f32[32,32], index: 1, kind: input, shape index: {}]   ;;  %s2479_s2 = inlined_call_operand.vmem [shape: f32[32,1], index: 2, kind: input, shape index: {}]   ;;  %s2480_s3 = inlined_call_operand.vmem [shape: f32[32,32], index: 3, kind: input, shape index: {}]   ;;  %s2481_s4 = inlined_call_operand.vmem [shape: f32[32,1], index: 4, kind: input, shape index: {}]   ;;  %s2482_s5 = inlined_call_operand.vmem [shape: f32[4,32], index: 5, kind: input, shape index: {}]   ;;  %s2483_s6 = inlined_call_operand.vmem [shape: f32[4,1], index: 6, kind: input, shape index: {}]   ;;  %s2484_s7 = inlined_call_operand.hbm [shape: f32[2,4,4096], index: 7, kind: output, shape index: {}]  }
   0x1   :  { %2491 = sst [smem:[#allocation11_spill]] %s2484_s7 }
   0x2   :  { %12 = vsyncpa [#allocation3], 0 }
   0x3   :  { %14 = vsyncpa [#allocation3 + $0x1], 0 }
   0x4   :  { %15 = vsyncpa [#allocation4], 0 }
   0x5   :  { %17 = vsyncpa [#allocation4 + $0x1], 0  ;;  %s2035_s24 = smov 0   ;;  %s2037_s25 = smov 0  }
   0x6   :  { %s2039_s26 = smov 0   ;;  %s2041_s27 = smov 0  }
   0x7   :  { %s2043_s28 = smov 0   ;;  %s2045_s29 = smov 0  }
   0x8   :  { %s2047_s30 = smov 0   ;;  %s2049_s8 = smov 0  }
   0x9 LB: > { %2492 = sst [smem:[#allocation8_spill]] %s1958_s24  ;;  %s1624_s9 = sadd.s32 4294967295, %s1986_s8   ;;  %s1986_s8 = sphi %s2049_s8, %s23_s8   ;;  %s1982_s30 = sphi %s2047_s30, %s2513_s30   ;;  %s1978_s29 = sphi %s2045_s29, %s2512_s29   ;;  %s1974_s28 = sphi %s2043_s28, %s2511_s28   ;;  %s1970_s27 = sphi %s2041_s27, %s2510_s27   ;;  %s1966_s26 = sphi %s2039_s26, %s2509_s26   ;;  %s1962_s25 = sphi %s2037_s25, %s2508_s25   ;;  %s1958_s24 = sphi %s2035_s24, %s2507_s24  }
   0xa   : > { %s1625_s10 = sadd.s32 4294967294, %s1986_s8   ;;  %s32_s11 = sadd.s32 1, %s1978_s29 }
   0xb   : > { %s35_s12 = sadd.s32 1, %s1982_s30  ;;  %p33_p0 = scmp.ge.s32.totalorder %s32_s11, 4 }
   0xc   : > { %s44_s13 = sadd.s32 1, %s1966_s26  ;;  %p51_p1 = scmp.ne.s32.totalorder %s1966_s26, %s1962_s25 }
   0xd   : > { %p52_p2 = scmp.eq.s32.totalorder %s1986_s8, 0  ;;  %s2515_s11 = smov (%p33_p0, %s32_s11), 0 }
   0xe   : > { %2493 = sst [smem:[#allocation9_spill]] %s2515_s11  ;;  %s2517_s12 = smov (!%p33_p0, %s35_s12), %s1982_s30 }
   0xf   : > { %s40_s14 = ssub.s32 %s1978_s29, %s2515_s11  ;;  %p2088_p3 = por %p52_p2, %p51_p1 }
  0x10   : > { %p37_p4 = scmp.ge.s32.totalorder %s2517_s12, 2  ;;  %p57_p5 = scmp.ne.s32.totalorder %s1962_s25, %s1958_s24 }
  0x11   : > { %p58_p6 = scmp.eq.s32.totalorder %s1624_s9, 0  ;;  %p209_p7 = scmp.eq.s32.totalorder %s1624_s9, 7 }
  0x12   : > { %s2519_s12 = smov (%p37_p4, %s2517_s12), 0  ;;  %p215_p10 = scmp.eq.s32.totalorder %s1625_s10, 7 }
  0x13   : > { %p2096_p8 = por %p58_p6, %p57_p5  ;;  %p2100_p9 = por %p209_p7, %p51_p1 }
  0x14   : > { %s39_s18 = ssub.s32 %s1982_s30, %s2519_s12  ;;  %p2106_p12 = por %p215_p10, %p57_p5 }
  0x15   : > { %s2496_s17 = scalar_select %p2100_p9, 1, 0 }
  0x16   : > { %s41_s19 = sor.u32 %s40_s14, %s39_s18  ;;  %p1785_p13 = scmp.lt.s32.totalorder %s1986_s8, 8 }
  0x17   : > { %2497 = sst [smem:[#allocation10_spill]] %s2496_s17  ;;  %p42_p11 = scmp.eq.s32.totalorder %s41_s19, 0 }
  0x18   : > { %s2498_s20 = scalar_select %p2106_p12, 1, 0 }
  0x19   : > { %s253_s21 = sand.u32 1, %s1966_s26   ;;  %s1629_s9 = sshll.u32 %s1978_s29, 3 }
  0x1a   : > { %s2113_s22 = scalar_select %p42_p11, %s1966_s26, %s44_s13  }
  0x1b   : > { %s1628_s23 = sshll.u32 %s253_s21, 8  ;;  %s1630_s11 = sshll.u32 %s1982_s30, 7 }
  0x1c   : > { %s257_s24 = scalar_lea.vmem [#allocation2], %s1628_s23  ;;  %s263_s17 = sadd.s32 %s1630_s11, %s1629_s9 }
  0x1d   : > { %s266_s7 = sshll.u32 %s257_s24, 4  ;;  %s1631_s10 = sshll.u32 %s263_s17, 7  ;;  %s2117_s7 = int_to_ptr.vmem [resolvable:$true] %s266_s7 }
  0x1e   : > { %p2121_p0 = pnand %p1785_p13, %p2088_p3  ;;  %s2128_s13 = scalar_lea.hbm %s2477_s0, %s1631_s10 }
  0x1f   : > { %s2131_s24 = scalar_lea.sflag [#allocation3], %s253_s21  ;;  %s1858_s11 = scalar_lea.hbm %s2128_s13, 4096 }
  0x20   : > { %p1859_p2 = scmp.ne.s32.totalorder %s2128_s13, %s1858_s11  ;;  %p1860_p3 = pneg %p2121_p0 }
  0x21   : > { %s1863_s23 = scalar_lea.hbm %s2477_s0, 32768  ;;  %p1864_p6 = scmp.lt.u32.totalorder %s2128_s13, %s2477_s0 }
  0x22   : > { %p1861_p4 = pnand %p1860_p3, %p1859_p2  ;;  %p1865_p7 = scmp.lt.u32.totalorder %s1863_s23, %s1858_s11 }
  0x23   : > { %p1867_p11 = scmp.lt.u32.totalorder %s1858_s11, %s2128_s13 }
  0x24   : > { %p1862_p5 = pneg %p1861_p4  ;;  %p1866_p10 = por %p1865_p7, %p1864_p6 }
  0x26   : > { %p1868_p13 = por %p1867_p11, %p1866_p10 }
  0x28   : > { %p1869_p1 = pnand %p1868_p13, %p1862_p5 }
  0x2a   : > { %1872 = shalt.err (!%p1869_p1)
}
  0x2b   : > { %s1873_s21 = scalar_lea.vmem %s2117_s7, 4096  ;;  %s1988_s18 = smov [#allocation2]  }
  0x2c   : > { %p1874_p2 = scmp.ne.s32.totalorder %s2117_s7, %s1873_s21  ;;  %s1878_s19 = sshll.u32 %s1988_s18, 4  ;;  %s1879_s19 = int_to_ptr.vmem [resolvable:$false] %s1878_s19 }
  0x2d   : > { %s1880_s15 = scalar_lea.vmem %s1879_s19, 8192  ;;  %p1881_p9 = scmp.lt.s32.totalorder %s2117_s7, %s1879_s19 }
  0x2e   : > { %p1876_p4 = pnand %p1874_p2, %p1860_p3  ;;  %p1882_p6 = scmp.lt.s32.totalorder %s1880_s15, %s1873_s21 }
  0x30   : > { %p1877_p12 = pneg %p1876_p4  ;;  %p1883_p7 = por %p1882_p6, %p1881_p9 }
  0x32   : > { %p1884_p10 = pnand %p1883_p7, %p1877_p12 }
  0x34   : > { %1887 = shalt.err (!%p1884_p10)
}
  0x35   : > { %s1989_s11 = smov 4096   ;;  %s1990_s17 = smov 1024  }
  0x36   : > { %s1991_s23 = smov 64   ;;  %p274_p1 = scmp.lt.s32.totalorder %s1986_s8, 9 }
  0x37   : > { %1780 = dma.hbm_to_vmem [thread:$0]  (!%p2121_p0), %s2128_s13, 4096, %s2117_s7, %s2131_s24, %s1989_s11, %s1990_s17, %s1991_s23  }
  0x38   : > { %p2500_p3 = scmp.ge.s32.totalorder %s1986_s8, 1 }
  0x3a   : > { %p275_p5 = pnand %p2500_p3, %p274_p1 }
  0x3b   : > { %s2163_s9 = sand.u32 (!%p275_p5), 1, %s1962_s25  }
  0x3c   : > { %278 = sbr.rel (%p275_p5) target bundleno = 798 (0x31e), region = 48  ;;  %s1633_s10 = sshll.u32 (!%p275_p5), %s2163_s9, 8 }
  0x3d   : > { %s281_s21 = scalar_lea.sflag (!%p275_p5), [#allocation3], %s2163_s9  ;;  %s2167_s18 = scalar_lea.vmem (!%p275_p5), [#allocation2], %s1633_s10 }
  0x43   : > { %1949 = dma.done.wait (%p2096_p8), %s281_s21, 4096  }
  0x44   : > { %1951 = vsyncadd (%p2096_p8), %s281_s21, 4294963200  ;;  %v1992_v0 = vmov 0.0   ;;  %v1993_v1 = vmov 0   ;;  %v318_v2 = vld [vmem:[%s2167_s18 + $0x8] sm:$0xff]  ;;  %v320_v4 = vld [vmem:[%s2167_s18 + $0x18] sm:$0xff]  ;;  %vm377_vm0 = vcmask 261120  }
  0x45   : > { %454 = vmatprep.mubr.f32.mxu0 %v1992_v0  ;;  %543 = vmatprep.mubr.f32.mxu1 %v1992_v0  ;;  %v326_v3 = vld [vmem:[%s2167_s18 + $0x48] sm:$0xff]  ;;  %v328_v6 = vld [vmem:[%s2167_s18 + $0x58] sm:$0xff]  ;;  %v317_v7 = vld [vmem:[%s2167_s18] sm:$0xff]  ;;  %s1634_s10 = sshll.u32 %s2163_s9, 5  ;;  %s1673_s7 = sshll.u32 %s1974_s28, 5 }
  0x46   : > { %1856 = vset.pattern.permute.xlu0 %v1993_v1  ;;  %1857 = vset.pattern.permute.xlu1 %v1993_v1  ;;  %v1677_v5 = vpack.c.bf16 %v326_v3, %v318_v2  ;;  %v325_v8 = vld [vmem:[%s2167_s18 + $0x40] sm:$0xff]  ;;  %v1685_v9 = vpack.c.bf16 %v328_v6, %v320_v4  ;;  %v319_v11 = vld [vmem:[%s2167_s18 + $0x10] sm:$0xff]  ;;  %v334_v13 = vld [vmem:[%s2167_s18 + $0x88] sm:$0xff]  ;;  %s314_s21 = scalar_lea.vmem [#allocation5], %s1634_s10  ;;  %s2501_s14 = sld [smem:[#allocation10_spill]] }
  0x47   : > { %v1679_v10 = vpack.c.bf16 %v325_v8, %v317_v7  ;;  %v327_v12 = vld [vmem:[%s2167_s18 + $0x50] sm:$0xff]  ;;  %v342_v15 = vld [vmem:[%s2167_s18 + $0xc8] sm:$0xff]  ;;  %v336_v16 = vld [vmem:[%s2167_s18 + $0x98] sm:$0xff]  ;;  %s1537_s24 = sshll.u32 %s314_s21, 4  ;;  %s2502_s11 = sld [smem:[#allocation11_spill]]  ;;  %s2425_s24 = int_to_ptr.vmem [resolvable:$true] %s1537_s24 }
  0x48   : > { %1678 = vmatprep.subr.bf16.mxu0 %v1677_v5  ;;  %v1687_v14 = vpack.c.bf16 %v327_v12, %v319_v11  ;;  %v344_v17 = vld [vmem:[%s2167_s18 + $0xd8] sm:$0xff]  ;;  %1686 = vmatprep.subr.bf16.mxu1 %v1685_v9  ;;  %v1681_v18 = vpack.c.bf16 %v342_v15, %v334_v13  ;;  %v333_v20 = vld [vmem:[%s2167_s18 + $0x80] sm:$0xff]  ;;  %v335_v22 = vld [vmem:[%s2167_s18 + $0x90] sm:$0xff]  ;;  %s1521_s28 = scalar_lea.sflag [#allocation4], %s2163_s9  ;;  %s1888_s17 = scalar_lea.vmem %s2425_s24, 512 }
  0x49   : > { %1680 = vmatpush1.bf16.msra.mxu0 %v1679_v10  ;;  %v1689_v19 = vpack.c.bf16 %v344_v17, %v336_v16  ;;  %v341_v21 = vld [vmem:[%s2167_s18 + $0xc0] sm:$0xff]  ;;  %v343_v24 = vld [vmem:[%s2167_s18 + $0xd0] sm:$0xff]  ;;  %v322_v26 = vld [vmem:[%s2167_s18 + $0x28] sm:$0xff]  ;;  %p1889_p8 = scmp.ne.s32.totalorder %s2425_s24, %s1888_s17  ;;  %s1994_s23 = smov [#allocation5]  }
  0x4a   : > { %1688 = vmatpush1.bf16.msra.mxu1 %v1687_v14  ;;  %v1683_v23 = vpack.c.bf16 %v341_v21, %v333_v20  ;;  %1682 = vmatprep.subr.bf16.mxu0 %v1681_v18  ;;  %v1691_v25 = vpack.c.bf16 %v343_v24, %v335_v22  ;;  %v330_v27 = vld [vmem:[%s2167_s18 + $0x68] sm:$0xff]  ;;  %v324_v28 = vld [vmem:[%s2167_s18 + $0x38] sm:$0xff]  ;;  %v321_v31 = vld [vmem:[%s2167_s18 + $0x20] sm:$0xff]  ;;  %s1892_s10 = sshll.u32 %s1994_s23, 4  ;;  %s1893_s10 = int_to_ptr.vmem [resolvable:$false] %s1892_s10 }
  0x4b   : > { %1690 = vmatprep.subr.bf16.mxu1 %v1689_v19  ;;  %v1693_v29 = vpack.c.bf16 %v330_v27, %v322_v26  ;;  %v332_v30 = vld [vmem:[%s2167_s18 + $0x78] sm:$0xff]  ;;  %v329_v32 = vld [vmem:[%s2167_s18 + $0x60] sm:$0xff]  ;;  %v323_v35 = vld [vmem:[%s2167_s18 + $0x30] sm:$0xff]  ;;  %p1895_p11 = scmp.lt.s32.totalorder %s2425_s24, %s1893_s10 }
  0x4c   : > { %v349_v33 = vld [vmem:[%s2478_s1] sm:$0xff]  ;;  %v1701_v34 = vpack.c.bf16 %v332_v30, %v324_v28  ;;  %v331_v36 = vld [vmem:[%s2167_s18 + $0x70] sm:$0xff]  ;;  %v1695_v37 = vpack.c.bf16 %v329_v32, %v321_v31  ;;  %v338_v38 = vld [vmem:[%s2167_s18 + $0xa8] sm:$0xff]  ;;  %p2503_p9 = scmp.ne.s32.totalorder %s2501_s14, 0 }
  0x4d   : > { %1684 = vmatpush1.bf16.msra.mxu0 %v1683_v23  ;;  %v346_v39 = vld [vmem:[%s2167_s18 + $0xe8] sm:$0xff]  ;;  %v1703_v40 = vpack.c.bf16 %v331_v36, %v323_v35  ;;  %v340_v42 = vld [vmem:[%s2167_s18 + $0xb8] sm:$0xff]  ;;  %v337_v44 = vld [vmem:[%s2167_s18 + $0xa0] sm:$0xff] }
  0x4e   : > { %1692 = vmatpush1.bf16.msra.mxu1 %v1691_v25  ;;  %1694 = vmatprep.subr.bf16.mxu0 %v1693_v29  ;;  %v1697_v41 = vpack.c.bf16 %v346_v39, %v338_v38  ;;  %v348_v43 = vld [vmem:[%s2167_s18 + $0xf8] sm:$0xff]  ;;  %v345_v46 = vld [vmem:[%s2167_s18 + $0xe0] sm:$0xff]  ;;  %v339_v47 = vld [vmem:[%s2167_s18 + $0xb0] sm:$0xff]  ;;  %p1890_p12 = pnand %p1889_p8, %p2503_p9 }
  0x4f   : > { %1702 = vmatprep.subr.bf16.mxu1 %v1701_v34  ;;  %v1705_v45 = vpack.c.bf16 %v348_v43, %v340_v42  ;;  %v347_v48 = vld [vmem:[%s2167_s18 + $0xf0] sm:$0xff]  ;;  %v350_v49 = vld [vmem:[%s2478_s1 + $0x8] sm:$0xff]  ;;  %v1699_v50 = vpack.c.bf16 %v345_v46, %v337_v44  ;;  %v353_v52 = vld [vmem:[%s2479_s2] sm:$0xff]  ;;  %s1672_s18 = sshll.u32 %s1970_s27, 3 }
  0x50   : > { %1635 = vmatmul.mubr.msk.f32.vlgmr.msra.gmra.mrb[0].mxu0 %vm377_vm0, %v349_v33  ;;  %v1707_v51 = vpack.c.bf16 %v347_v48, %v339_v47  ;;  %v351_v53 = vld [vmem:[%s2478_s1 + $0x10] sm:$0xff]  ;;  %359 = vperm.xlu0 %1856, %v353_v52   ;;  %v354_v55 = vld [vmem:[%s2479_s2 + $0x8] sm:$0xff]  ;;  %v352_v56 = vld [vmem:[%s2478_s1 + $0x18] sm:$0xff]  ;;  %s1533_s16 = sadd.s32 %s1673_s7, %s1672_s18  ;;  %p1891_p0 = pneg %p1890_p12 }
  0x51   : > { %1639 = vmatmul.mubr.msk.f32.vlgmr.msra.gmra.mrb[0].mxu1 %vm377_vm0, %v349_v33  ;;  %460 = vmatprep.mubr.f32.mxu0 %v1992_v0  ;;  %v355_v54 = vld [vmem:[%s2479_s2 + $0x10] sm:$0xff]  ;;  %v356_v57 = vld [vmem:[%s2479_s2 + $0x18] sm:$0xff]  ;;  %v782_v58 = vld [vmem:[%s2481_s4] sm:$0xff]  ;;  %s1674_s13 = sshll.u32 %s1533_s16, 6  ;;  %s1894_s18 = scalar_lea.vmem %s1893_s10, 1024 }
  0x52   : > { %549 = vmatprep.mubr.f32.mxu1 %v1992_v0  ;;  %1696 = vmatpush1.bf16.msra.mxu0 %v1695_v37  ;;  %v783_v59 = vld [vmem:[%s2481_s4 + $0x8] sm:$0xff]  ;;  %v784_v60 = vld [vmem:[%s2481_s4 + $0x10] sm:$0xff]  ;;  %v785_v61 = vld [vmem:[%s2481_s4 + $0x18] sm:$0xff]  ;;  %s2423_s27 = scalar_lea.hbm %s2502_s11, %s1674_s13  ;;  %p1896_p13 = scmp.lt.s32.totalorder %s1894_s18, %s1888_s17 }
  0x53   : > { %1704 = vmatpush1.bf16.msra.mxu1 %v1703_v40  ;;  %1698 = vmatprep.subr.bf16.mxu0 %v1697_v41  ;;  %v1207_v62 = vld [vmem:[%s2483_s6] sm:$0xf] }
  0x54   : > { %1636 = vmatmul.mubr.msk.f32.gmra.mrb[2].mxu0 %vm377_vm0, %v350_v49  ;;  %1706 = vmatprep.subr.bf16.mxu1 %v1705_v45  ;;  %p1897_p2 = por %p1896_p13, %p1895_p11 }
  0x55   : > { %1640 = vmatmul.mubr.msk.f32.gmra.mrb[2].mxu1 %vm377_vm0, %v350_v49  ;;  %466 = vmatprep.mubr.f32.mxu0 %v1992_v0 }
  0x56   : > { %555 = vmatprep.mubr.f32.mxu1 %v1992_v0  ;;  %1700 = vmatpush1.bf16.msra.mxu0 %v1699_v50  ;;  %p1898_p4 = pnand %p1897_p2, %p1891_p0 }
  0x57   : > { %1708 = vmatpush1.bf16.msra.mxu1 %v1707_v51  ;;  %369 = vperm.xlu1 %1857, %v355_v54  }
  0x58   : > { %1637 = vmatmul.mubr.msk.f32.gmra.mrb[4].mxu0 %vm377_vm0, %v351_v53  ;;  %364 = vperm.xlu0 %1856, %v354_v55  }
  0x59   : > { %1641 = vmatmul.mubr.msk.f32.gmra.mrb[4].mxu1 %vm377_vm0, %v351_v53  ;;  %472 = vmatprep.mubr.f32.mxu0 %v1992_v0 }
  0x5a   : > { %561 = vmatprep.mubr.f32.mxu1 %v1992_v0 }
  0x5b   : > { %374 = vperm.xlu1 %1857, %v356_v57  }
  0x5c   : > { %1638 = vmatmul.mubr.msk.f32.gmra.mrb[6].mxu0 %vm377_vm0, %v352_v56  ;;  %788 = vperm.xlu0 %1856, %v782_v58  }
  0x5d   : > { %1642 = vmatmul.mubr.msk.f32.gmra.mrb[6].mxu1 %vm377_vm0, %v352_v56  ;;  %632 = vmatprep.mubr.f32.mxu0 %v1992_v0 }
  0x5e   : > { %721 = vmatprep.mubr.f32.mxu1 %v1992_v0 }
  0x5f   : > { %793 = vperm.xlu1 %1857, %v783_v59  }
  0x60   : > { %1643 = vmatmul.mubr.msk.f32.vlgmr.msra.gmra.mrb[8].mxu0 %vm377_vm0, %v349_v33  ;;  %798 = vperm.xlu0 %1856, %v784_v60  }
  0x61   : > { %1647 = vmatmul.mubr.msk.f32.vlgmr.msra.gmra.mrb[8].mxu1 %vm377_vm0, %v349_v33  ;;  %638 = vmatprep.mubr.f32.mxu0 %v1992_v0 }
  0x62   : > { %727 = vmatprep.mubr.f32.mxu1 %v1992_v0 }
  0x63   : > { %803 = vperm.xlu1 %1857, %v785_v61  }
  0x64   : > { %1644 = vmatmul.mubr.msk.f32.gmra.mrb[10].mxu0 %vm377_vm0, %v350_v49  ;;  %1210 = vperm.xlu0 %1856, %v1207_v62  }
  0x65   : > { %1648 = vmatmul.mubr.msk.f32.gmra.mrb[10].mxu1 %vm377_vm0, %v350_v49  ;;  %644 = vmatprep.mubr.f32.mxu0 %v1992_v0 }
  0x66   : > { %733 = vmatprep.mubr.f32.mxu1 %v1992_v0 }
  0x68   : > { %1645 = vmatmul.mubr.msk.f32.gmra.mrb[12].mxu0 %vm377_vm0, %v351_v53 }
  0x69   : > { %1649 = vmatmul.mubr.msk.f32.gmra.mrb[12].mxu1 %vm377_vm0, %v351_v53  ;;  %650 = vmatprep.mubr.f32.mxu0 %v1992_v0 }
  0x6a   : > { %739 = vmatprep.mubr.f32.mxu1 %v1992_v0 }
  0x6c   : > { %1646 = vmatmul.mubr.msk.f32.gmra.mrb[14].mxu0 %vm377_vm0, %v352_v56 }
  0x6d   : > { %1650 = vmatmul.mubr.msk.f32.gmra.mrb[14].mxu1 %vm377_vm0, %v352_v56  ;;  %882 = vmatprep.mubr.f32.mxu0 %v1992_v0 }
  0x6e   : > { %971 = vmatprep.mubr.f32.mxu1 %v1992_v0 }
  0xcf   : > { %v2278_v63 = vpop.permute.xlu0 %359 }
  0xd6   : > { %v2287_v14 = vpop.permute.xlu1 %369 }
  0xd7   : > { %v2281_v6 = vpop.permute.xlu0 %364 }
  0xda   : > { %v2293_v36 = vpop.permute.xlu1 %374 }
 0x123   : > { %v456_v1 = vpop.f32.mrb[0].mxu0 }
 0x124   : > { %v545_v2 = vpop.f32.mrb[0].mxu1  ;;  %v458_v3 = vpop.f32.mrb[1].mxu0  ;;  %v457_v5 = vadd.f32 %v456_v1, %v2278_v63 }
 0x125   : > { %v547_v4 = vpop.f32.mrb[1].mxu1  ;;  %v546_v7 = vadd.f32 %v545_v2, %v2278_v63  ;;  %v459_v8 = vadd.f32 %v458_v3, %v2278_v63 }
 0x126   : > { %v548_v10 = vadd.f32 %v547_v4, %v2278_v63  ;;  %v746_v18 = vmax.f32 %v457_v5, 0.0 }
 0x127   : > { %v462_v9 = vpop.f32.mrb[2].mxu0  ;;  %v748_v21 = vmax.f32 %v546_v7, 0.0  ;;  %v747_v22 = vmax.f32 %v459_v8, 0.0 }
 0x128   : > { %v463_v11 = vadd.f32 %v462_v9, %v2281_v6  ;;  %v551_v12 = vpop.f32.mrb[2].mxu1  ;;  %v464_v13 = vpop.f32.mrb[3].mxu0  ;;  %v749_v26 = vmax.f32 %v548_v10, 0.0 }
 0x129   : > { %v552_v15 = vadd.f32 %v551_v12, %v2281_v6  ;;  %v465_v16 = vadd.f32 %v464_v13, %v2281_v6  ;;  %v553_v17 = vpop.f32.mrb[3].mxu1 }
 0x12a   : > { %v754_v19 = vmax.f32 %v463_v11, 0.0  ;;  %v554_v20 = vadd.f32 %v553_v17, %v2281_v6  ;;  %v2310_v11 = vld [vmem:[%s2480_s3] sm:$0xff] }
 0x12b   : > { %v756_v23 = vmax.f32 %v552_v15, 0.0  ;;  %v755_v24 = vmax.f32 %v465_v16, 0.0  ;;  %v468_v25 = vpop.f32.mrb[4].mxu0 }
 0x12c   : > { %v1711_v27 = vpack.c.bf16 %v754_v19, %v746_v18  ;;  %v757_v28 = vmax.f32 %v554_v20, 0.0  ;;  %v557_v29 = vpop.f32.mrb[4].mxu1  ;;  %v470_v30 = vpop.f32.mrb[5].mxu0  ;;  %v469_v35 = vadd.f32 %v468_v25, %v2287_v14 }
 0x12d   : > { %v1719_v31 = vpack.c.bf16 %v756_v23, %v748_v21  ;;  %v1709_v32 = vpack.c.bf16 %v755_v24, %v747_v22  ;;  %v559_v33 = vpop.f32.mrb[5].mxu1  ;;  %v558_v37 = vadd.f32 %v557_v29, %v2287_v14  ;;  %v471_v38 = vadd.f32 %v470_v30, %v2287_v14 }
 0x12e   : > { %v1717_v34 = vpack.c.bf16 %v757_v28, %v749_v26  ;;  %v560_v40 = vadd.f32 %v559_v33, %v2287_v14  ;;  %v762_v47 = vmax.f32 %v469_v35, 0.0 }
 0x12f   : > { %v474_v39 = vpop.f32.mrb[6].mxu0  ;;  %1710 = vmatprep.subr.bf16.mxu0 %v1709_v32  ;;  %v764_v50 = vmax.f32 %v558_v37, 0.0  ;;  %v763_v51 = vmax.f32 %v471_v38, 0.0 }
 0x130   : > { %v475_v41 = vadd.f32 %v474_v39, %v2293_v36  ;;  %v563_v42 = vpop.f32.mrb[6].mxu1  ;;  %1718 = vmatprep.subr.bf16.mxu1 %v1717_v34  ;;  %v476_v43 = vpop.f32.mrb[7].mxu0  ;;  %1712 = vmatpush1.bf16.msra.mxu0 %v1711_v27  ;;  %v765_v55 = vmax.f32 %v560_v40, 0.0 }
 0x131   : > { %v564_v44 = vadd.f32 %v563_v42, %v2293_v36  ;;  %v477_v45 = vadd.f32 %v476_v43, %v2293_v36  ;;  %v565_v46 = vpop.f32.mrb[7].mxu1  ;;  %1720 = vmatpush1.bf16.msra.mxu1 %v1719_v31 }
 0x132   : > { %v770_v48 = vmax.f32 %v475_v41, 0.0  ;;  %v566_v49 = vadd.f32 %v565_v46, %v2293_v36  ;;  %v780_v41 = vld [vmem:[%s2480_s3 + $0x10] sm:$0xff] }
 0x133   : > { %v772_v52 = vmax.f32 %v564_v44, 0.0  ;;  %v771_v53 = vmax.f32 %v477_v45, 0.0  ;;  %v634_v54 = vpop.f32.mrb[8].mxu0 }
 0x134   : > { %v1715_v56 = vpack.c.bf16 %v770_v48, %v762_v47  ;;  %v773_v57 = vmax.f32 %v566_v49, 0.0  ;;  %v723_v58 = vpop.f32.mrb[8].mxu1  ;;  %v636_v59 = vpop.f32.mrb[9].mxu0  ;;  %v635_v2 = vadd.f32 %v634_v54, %v2278_v63 }
 0x135   : > { %v1723_v60 = vpack.c.bf16 %v772_v52, %v764_v50  ;;  %v1713_v61 = vpack.c.bf16 %v771_v53, %v763_v51  ;;  %v725_v62 = vpop.f32.mrb[9].mxu1  ;;  %v724_v3 = vadd.f32 %v723_v58, %v2278_v63  ;;  %v637_v4 = vadd.f32 %v636_v59, %v2278_v63 }
 0x136   : > { %v1721_v1 = vpack.c.bf16 %v773_v57, %v765_v55  ;;  %v726_v7 = vadd.f32 %v725_v62, %v2278_v63  ;;  %v750_v16 = vmax.f32 %v635_v2, 0.0 }
 0x137   : > { %v640_v5 = vpop.f32.mrb[10].mxu0  ;;  %1714 = vmatprep.subr.bf16.mxu0 %v1713_v61  ;;  %v752_v18 = vmax.f32 %v724_v3, 0.0  ;;  %v751_v19 = vmax.f32 %v637_v4, 0.0 }
 0x138   : > { %v641_v8 = vadd.f32 %v640_v5, %v2281_v6  ;;  %v729_v9 = vpop.f32.mrb[10].mxu1  ;;  %1722 = vmatprep.subr.bf16.mxu1 %v1721_v1  ;;  %v642_v10 = vpop.f32.mrb[11].mxu0  ;;  %1716 = vmatpush1.bf16.msra.mxu0 %v1715_v56  ;;  %v753_v23 = vmax.f32 %v726_v7, 0.0 }
 0x139   : > { %v730_v12 = vadd.f32 %v729_v9, %v2281_v6  ;;  %v643_v13 = vadd.f32 %v642_v10, %v2281_v6  ;;  %v731_v15 = vpop.f32.mrb[11].mxu1  ;;  %1724 = vmatpush1.bf16.msra.mxu1 %v1723_v60  ;;  %v2368_v60 = vpop.permute.xlu0 %788 }
 0x13a   : > { %v758_v17 = vmax.f32 %v641_v8, 0.0  ;;  %v732_v63 = vadd.f32 %v731_v15, %v2281_v6  ;;  %v779_v6 = vld [vmem:[%s2480_s3 + $0x8] sm:$0xff]  ;;  %v2371_v1 = vpop.permute.xlu1 %793 }
 0x13b   : > { %v760_v20 = vmax.f32 %v730_v12, 0.0  ;;  %v759_v21 = vmax.f32 %v643_v13, 0.0  ;;  %v646_v22 = vpop.f32.mrb[12].mxu0  ;;  %1651 = vmatmul.mubr.msk.f32.vlgmr.msra.gmra.mrb[16].mxu0 %vm377_vm0, %v2310_v11 }
 0x13c   : > { %v1727_v24 = vpack.c.bf16 %v758_v17, %v750_v16  ;;  %v761_v25 = vmax.f32 %v732_v63, 0.0  ;;  %v735_v26 = vpop.f32.mrb[12].mxu1  ;;  %1655 = vmatmul.mubr.msk.f32.vlgmr.msra.gmra.mrb[16].mxu1 %vm377_vm0, %v2310_v11  ;;  %v648_v27 = vpop.f32.mrb[13].mxu0  ;;  %888 = vmatprep.mubr.f32.mxu0 %v1992_v0  ;;  %v647_v32 = vadd.f32 %v646_v22, %v2287_v14 }
 0x13d   : > { %v1735_v28 = vpack.c.bf16 %v760_v20, %v752_v18  ;;  %v1725_v29 = vpack.c.bf16 %v759_v21, %v751_v19  ;;  %v737_v30 = vpop.f32.mrb[13].mxu1  ;;  %977 = vmatprep.mubr.f32.mxu1 %v1992_v0  ;;  %v736_v33 = vadd.f32 %v735_v26, %v2287_v14  ;;  %v649_v34 = vadd.f32 %v648_v27, %v2287_v14  ;;  %v2380_v26 = vpop.permute.xlu0 %798 }
 0x13e   : > { %v1733_v31 = vpack.c.bf16 %v761_v25, %v753_v23  ;;  %v738_v37 = vadd.f32 %v737_v30, %v2287_v14  ;;  %v766_v45 = vmax.f32 %v647_v32, 0.0 }
 0x13f   : > { %v652_v35 = vpop.f32.mrb[14].mxu0  ;;  %1652 = vmatmul.mubr.msk.f32.gmra.mrb[18].mxu0 %vm377_vm0, %v779_v6  ;;  %1726 = vmatprep.subr.bf16.mxu0 %v1725_v29  ;;  %v768_v47 = vmax.f32 %v736_v33, 0.0  ;;  %v767_v48 = vmax.f32 %v649_v34, 0.0 }
 0x140   : > { %v653_v38 = vadd.f32 %v652_v35, %v2293_v36  ;;  %v741_v39 = vpop.f32.mrb[14].mxu1  ;;  %1656 = vmatmul.mubr.msk.f32.gmra.mrb[18].mxu1 %vm377_vm0, %v779_v6  ;;  %1734 = vmatprep.subr.bf16.mxu1 %v1733_v31  ;;  %v654_v40 = vpop.f32.mrb[15].mxu0  ;;  %v769_v51 = vmax.f32 %v738_v37, 0.0 }
 0x141   : > { %v742_v42 = vadd.f32 %v741_v39, %v2293_v36  ;;  %v655_v43 = vadd.f32 %v654_v40, %v2293_v36  ;;  %v743_v44 = vpop.f32.mrb[15].mxu1  ;;  %1728 = vmatpush1.bf16.msra.mxu0 %v1727_v24  ;;  %1736 = vmatpush1.bf16.msra.mxu1 %v1735_v28  ;;  %v2383_v31 = vpop.permute.xlu1 %803 }
 0x142   : > { %v774_v14 = vmax.f32 %v653_v38, 0.0  ;;  %v744_v46 = vadd.f32 %v743_v44, %v2293_v36  ;;  %894 = vmatprep.mubr.f32.mxu0 %v1992_v0  ;;  %983 = vmatprep.mubr.f32.mxu1 %v1992_v0  ;;  %v781_v36 = vld [vmem:[%s2480_s3 + $0x18] sm:$0xff] }
 0x143   : > { %v776_v49 = vmax.f32 %v742_v42, 0.0  ;;  %v775_v50 = vmax.f32 %v655_v43, 0.0  ;;  %1653 = vmatmul.mubr.msk.f32.gmra.mrb[20].mxu0 %vm377_vm0, %v780_v41 }
 0x144   : > { %v1731_v52 = vpack.c.bf16 %v774_v14, %v766_v45  ;;  %v777_v53 = vmax.f32 %v744_v46, 0.0  ;;  %1657 = vmatmul.mubr.msk.f32.gmra.mrb[20].mxu1 %vm377_vm0, %v780_v41  ;;  %900 = vmatprep.mubr.f32.mxu0 %v1992_v0 }
 0x145   : > { %v1739_v54 = vpack.c.bf16 %v776_v49, %v768_v47  ;;  %v1729_v55 = vpack.c.bf16 %v775_v50, %v767_v48  ;;  %989 = vmatprep.mubr.f32.mxu1 %v1992_v0 }
 0x146   : > { %v1737_v56 = vpack.c.bf16 %v777_v53, %v769_v51 }
 0x147   : > { %1654 = vmatmul.mubr.msk.f32.gmra.mrb[22].mxu0 %vm377_vm0, %v781_v36  ;;  %1730 = vmatprep.subr.bf16.mxu0 %v1729_v55 }
 0x148   : > { %1658 = vmatmul.mubr.msk.f32.gmra.mrb[22].mxu1 %vm377_vm0, %v781_v36  ;;  %1738 = vmatprep.subr.bf16.mxu1 %v1737_v56 }
 0x149   : > { %1732 = vmatpush1.bf16.msra.mxu0 %v1731_v52  ;;  %1740 = vmatpush1.bf16.msra.mxu1 %v1739_v54 }
 0x14a   : > { %1060 = vmatprep.mubr.f32.mxu0 %v1992_v0  ;;  %1149 = vmatprep.mubr.f32.mxu1 %v1992_v0 }
 0x14c   : > { %1659 = vmatmul.mubr.msk.f32.vlgmr.msra.gmra.mrb[24].mxu0 %vm377_vm0, %v2310_v11  ;;  %1663 = vmatmul.mubr.msk.f32.vlgmr.msra.gmra.mrb[24].mxu1 %vm377_vm0, %v2310_v11 }
 0x14d   : > { %1066 = vmatprep.mubr.f32.mxu0 %v1992_v0  ;;  %1155 = vmatprep.mubr.f32.mxu1 %v1992_v0 }
 0x150   : > { %1660 = vmatmul.mubr.msk.f32.gmra.mrb[26].mxu0 %vm377_vm0, %v779_v6  ;;  %1664 = vmatmul.mubr.msk.f32.gmra.mrb[26].mxu1 %vm377_vm0, %v779_v6 }
 0x151   : > { %1072 = vmatprep.mubr.f32.mxu0 %v1992_v0  ;;  %1161 = vmatprep.mubr.f32.mxu1 %v1992_v0 }
 0x154   : > { %1661 = vmatmul.mubr.msk.f32.gmra.mrb[28].mxu0 %vm377_vm0, %v780_v41  ;;  %1665 = vmatmul.mubr.msk.f32.gmra.mrb[28].mxu1 %vm377_vm0, %v780_v41 }
 0x155   : > { %1078 = vmatprep.mubr.f32.mxu0 %v1992_v0  ;;  %1167 = vmatprep.mubr.f32.mxu1 %v1992_v0 }
 0x158   : > { %1662 = vmatmul.mubr.msk.f32.gmra.mrb[30].mxu0 %vm377_vm0, %v781_v36  ;;  %1666 = vmatmul.mubr.msk.f32.gmra.mrb[30].mxu1 %vm377_vm0, %v781_v36 }
 0x159   : > { %1280 = vmatprep.mubr.f32.mxu0 %v1992_v0  ;;  %1351 = vmatprep.mubr.f32.mxu1 %v1992_v0 }
 0x20e   : > { %v884_v57 = vpop.f32.mrb[16].mxu0 }
 0x20f   : > { %v973_v58 = vpop.f32.mrb[16].mxu1  ;;  %v886_v59 = vpop.f32.mrb[17].mxu0  ;;  %v885_v62 = vadd.f32 %v884_v57, %v2368_v60 }
 0x210   : > { %v975_v61 = vpop.f32.mrb[17].mxu1  ;;  %v974_v2 = vadd.f32 %v973_v58, %v2368_v60  ;;  %v887_v3 = vadd.f32 %v886_v59, %v2368_v60 }
 0x211   : > { %v976_v5 = vadd.f32 %v975_v61, %v2368_v60  ;;  %v1174_v13 = vmax.f32 %v885_v62, 0.0 }
 0x212   : > { %v890_v4 = vpop.f32.mrb[18].mxu0  ;;  %v1176_v17 = vmax.f32 %v974_v2, 0.0  ;;  %v1175_v63 = vmax.f32 %v887_v3, 0.0 }
 0x213   : > { %v891_v7 = vadd.f32 %v890_v4, %v2371_v1  ;;  %v979_v8 = vpop.f32.mrb[18].mxu1  ;;  %v892_v9 = vpop.f32.mrb[19].mxu0  ;;  %v1177_v21 = vmax.f32 %v976_v5, 0.0  ;;  %v1206_v4 = vld [vmem:[%s2482_s5] sm:$0xf] }
 0x214   : > { %v980_v10 = vadd.f32 %v979_v8, %v2371_v1  ;;  %v893_v11 = vadd.f32 %v892_v9, %v2371_v1  ;;  %v981_v12 = vpop.f32.mrb[19].mxu1 }
 0x215   : > { %v1182_v15 = vmax.f32 %v891_v7, 0.0  ;;  %v982_v16 = vadd.f32 %v981_v12, %v2371_v1 }
 0x216   : > { %v1184_v18 = vmax.f32 %v980_v10, 0.0  ;;  %v1183_v19 = vmax.f32 %v893_v11, 0.0  ;;  %v896_v20 = vpop.f32.mrb[20].mxu0 }
 0x217   : > { %v1743_v22 = vpack.c.bf16 %v1182_v15, %v1174_v13  ;;  %v1185_v23 = vmax.f32 %v982_v16, 0.0  ;;  %v985_v24 = vpop.f32.mrb[20].mxu1  ;;  %v898_v25 = vpop.f32.mrb[21].mxu0  ;;  %v897_v30 = vadd.f32 %v896_v20, %v2380_v26 }
 0x218   : > { %v1751_v27 = vpack.c.bf16 %v1184_v18, %v1176_v17  ;;  %v1741_v6 = vpack.c.bf16 %v1183_v19, %v1175_v63  ;;  %v987_v28 = vpop.f32.mrb[21].mxu1  ;;  %v986_v32 = vadd.f32 %v985_v24, %v2380_v26  ;;  %v899_v33 = vadd.f32 %v898_v25, %v2380_v26 }
 0x219   : > { %v1749_v29 = vpack.c.bf16 %v1185_v23, %v1177_v21  ;;  %v988_v35 = vadd.f32 %v987_v28, %v2380_v26  ;;  %v1190_v43 = vmax.f32 %v897_v30, 0.0 }
 0x21a   : > { %v902_v34 = vpop.f32.mrb[22].mxu0  ;;  %1742 = vmatprep.subr.bf16.mxu0 %v1741_v6  ;;  %v1192_v14 = vmax.f32 %v986_v32, 0.0  ;;  %v1191_v46 = vmax.f32 %v899_v33, 0.0 }
 0x21b   : > { %v903_v37 = vadd.f32 %v902_v34, %v2383_v31  ;;  %v991_v38 = vpop.f32.mrb[22].mxu1  ;;  %1750 = vmatprep.subr.bf16.mxu1 %v1749_v29  ;;  %v904_v39 = vpop.f32.mrb[23].mxu0  ;;  %1744 = vmatpush1.bf16.msra.mxu0 %v1743_v22  ;;  %v1193_v49 = vmax.f32 %v988_v35, 0.0 }
 0x21c   : > { %v992_v40 = vadd.f32 %v991_v38, %v2383_v31  ;;  %v905_v41 = vadd.f32 %v904_v39, %v2383_v31  ;;  %v993_v42 = vpop.f32.mrb[23].mxu1  ;;  %1752 = vmatpush1.bf16.msra.mxu1 %v1751_v27 }
 0x21d   : > { %v1198_v44 = vmax.f32 %v903_v37, 0.0  ;;  %v994_v45 = vadd.f32 %v993_v42, %v2383_v31 }
 0x21e   : > { %v1200_v47 = vmax.f32 %v992_v40, 0.0  ;;  %v1199_v48 = vmax.f32 %v905_v41, 0.0 }
 0x21f   : > { %v1747_v50 = vpack.c.bf16 %v1198_v44, %v1190_v43  ;;  %v1201_v51 = vmax.f32 %v994_v45, 0.0  ;;  %v1062_v52 = vpop.f32.mrb[24].mxu0  ;;  %v1151_v53 = vpop.f32.mrb[24].mxu1 }
 0x220   : > { %v1755_v36 = vpack.c.bf16 %v1200_v47, %v1192_v14  ;;  %v1745_v54 = vpack.c.bf16 %v1199_v48, %v1191_v46  ;;  %v1064_v55 = vpop.f32.mrb[25].mxu0  ;;  %v1153_v56 = vpop.f32.mrb[25].mxu1  ;;  %v1063_v58 = vadd.f32 %v1062_v52, %v2368_v60  ;;  %v1152_v59 = vadd.f32 %v1151_v53, %v2368_v60 }
 0x221   : > { %v1753_v57 = vpack.c.bf16 %v1201_v51, %v1193_v49  ;;  %v1065_v61 = vadd.f32 %v1064_v55, %v2368_v60  ;;  %v1154_v62 = vadd.f32 %v1153_v56, %v2368_v60 }
 0x222   : > { %1746 = vmatprep.subr.bf16.mxu0 %v1745_v54  ;;  %v1178_v60 = vmax.f32 %v1063_v58, 0.0  ;;  %v1180_v12 = vmax.f32 %v1152_v59, 0.0 }
 0x223   : > { %v1068_v2 = vpop.f32.mrb[26].mxu0  ;;  %v1157_v3 = vpop.f32.mrb[26].mxu1  ;;  %1754 = vmatprep.subr.bf16.mxu1 %v1753_v57  ;;  %1748 = vmatpush1.bf16.msra.mxu0 %v1747_v50  ;;  %v1179_v16 = vmax.f32 %v1065_v61, 0.0  ;;  %v1181_v17 = vmax.f32 %v1154_v62, 0.0 }
 0x224   : > { %v1069_v5 = vadd.f32 %v1068_v2, %v2371_v1  ;;  %v1158_v7 = vadd.f32 %v1157_v3, %v2371_v1  ;;  %v1070_v8 = vpop.f32.mrb[27].mxu0  ;;  %v1159_v9 = vpop.f32.mrb[27].mxu1  ;;  %1756 = vmatpush1.bf16.msra.mxu1 %v1755_v36 }
 0x225   : > { %v1071_v10 = vadd.f32 %v1070_v8, %v2371_v1  ;;  %v1160_v11 = vadd.f32 %v1159_v9, %v2371_v1 }
 0x226   : > { %v1186_v13 = vmax.f32 %v1069_v5, 0.0  ;;  %v1188_v15 = vmax.f32 %v1158_v7, 0.0  ;;  %1667 = vmatmul.mubr.msk.f32.vlgmr.msra.gmra.mrb[32].mxu0 %vm377_vm0, %v1206_v4 }
 0x227   : > { %v1187_v63 = vmax.f32 %v1071_v10, 0.0  ;;  %v1189_v18 = vmax.f32 %v1160_v11, 0.0  ;;  %v1074_v19 = vpop.f32.mrb[28].mxu0  ;;  %v1163_v20 = vpop.f32.mrb[28].mxu1  ;;  %1668 = vmatmul.mubr.msk.f32.vlgmr.msra.gmra.mrb[32].mxu1 %vm377_vm0, %v1206_v4  ;;  %1422 = vmatprep.mubr.f32.mxu0 %v1992_v0 }
 0x228   : > { %v1759_v21 = vpack.c.bf16 %v1186_v13, %v1178_v60  ;;  %v1767_v22 = vpack.c.bf16 %v1188_v15, %v1180_v12  ;;  %v1076_v23 = vpop.f32.mrb[29].mxu0  ;;  %v1165_v1 = vpop.f32.mrb[29].mxu1  ;;  %1493 = vmatprep.mubr.f32.mxu1 %v1992_v0  ;;  %v1075_v27 = vadd.f32 %v1074_v19, %v2380_v26  ;;  %v1164_v6 = vadd.f32 %v1163_v20, %v2380_v26 }
 0x229   : > { %v1757_v24 = vpack.c.bf16 %v1187_v63, %v1179_v16  ;;  %v1765_v25 = vpack.c.bf16 %v1189_v18, %v1181_v17  ;;  %v1077_v28 = vadd.f32 %v1076_v23, %v2380_v26  ;;  %v1166_v29 = vadd.f32 %v1165_v1, %v2380_v26 }
 0x22a   : > { %v1194_v39 = vmax.f32 %v1075_v27, 0.0  ;;  %v1196_v40 = vmax.f32 %v1164_v6, 0.0 }
 0x22b   : > { %v1080_v30 = vpop.f32.mrb[30].mxu0  ;;  %v1169_v32 = vpop.f32.mrb[30].mxu1  ;;  %1758 = vmatprep.subr.bf16.mxu0 %v1757_v24  ;;  %1766 = vmatprep.subr.bf16.mxu1 %v1765_v25  ;;  %v1195_v42 = vmax.f32 %v1077_v28, 0.0  ;;  %v1197_v43 = vmax.f32 %v1166_v29, 0.0 }
 0x22c   : > { %v1081_v33 = vadd.f32 %v1080_v30, %v2383_v31  ;;  %v1170_v34 = vadd.f32 %v1169_v32, %v2383_v31  ;;  %v1082_v35 = vpop.f32.mrb[31].mxu0  ;;  %v1171_v0 = vpop.f32.mrb[31].mxu1  ;;  %1760 = vmatpush1.bf16.msra.mxu0 %v1759_v21  ;;  %1768 = vmatpush1.bf16.msra.mxu1 %v1767_v22 }
 0x22d   : > { %v1083_v37 = vadd.f32 %v1082_v35, %v2383_v31  ;;  %v1172_v38 = vadd.f32 %v1171_v0, %v2383_v31  ;;  %v1211_v31 = vpop.permute.xlu0 %1210 }
 0x22e   : > { %v1202_v41 = vmax.f32 %v1081_v33, 0.0  ;;  %v1204_v26 = vmax.f32 %v1170_v34, 0.0 }
 0x22f   : > { %v1203_v44 = vmax.f32 %v1083_v37, 0.0  ;;  %v1205_v45 = vmax.f32 %v1172_v38, 0.0 }
 0x230   : > { %v1763_v14 = vpack.c.bf16 %v1202_v41, %v1194_v39  ;;  %v1771_v46 = vpack.c.bf16 %v1204_v26, %v1196_v40 }
 0x231   : > { %v1761_v47 = vpack.c.bf16 %v1203_v44, %v1195_v42  ;;  %v1769_v48 = vpack.c.bf16 %v1205_v45, %v1197_v43 }
 0x233   : > { %1762 = vmatprep.subr.bf16.mxu0 %v1761_v47  ;;  %1770 = vmatprep.subr.bf16.mxu1 %v1769_v48 }
 0x234   : > { %1764 = vmatpush1.bf16.msra.mxu0 %v1763_v14  ;;  %1772 = vmatpush1.bf16.msra.mxu1 %v1771_v46 }
 0x237   : > { %1669 = vmatmul.mubr.msk.f32.vlgmr.msra.gmra.mrb[34].mxu0 %vm377_vm0, %v1206_v4  ;;  %1670 = vmatmul.mubr.msk.f32.vlgmr.msra.gmra.mrb[34].mxu1 %vm377_vm0, %v1206_v4 }
 0x2f9   : > { %v1282_v49 = vpop.f32.mrb[32].mxu0 }
 0x2fa   : > { %v1283_v50 = vadd.f32 %v1282_v49, %v1211_v31  ;;  %v1353_v51 = vpop.f32.mrb[32].mxu1  ;;  %v1284_v52 = vpop.f32.mrb[33].mxu0 }
 0x2fb   : > { %v1354_v53 = vadd.f32 %v1353_v51, %v1211_v31  ;;  %v1285_v36 = vadd.f32 %v1284_v52, %v1211_v31  ;;  %v1355_v54 = vpop.f32.mrb[33].mxu1 }
 0x2fc   : > { %v1356_v55 = vadd.f32 %v1355_v54, %v1211_v31 }
 0x2fd   : > { %v1508_v56 = vcombine.low %v1283_v50, %v1285_v36 }
 0x2fe   : > { %v1509_v57 = vcombine.low %v1354_v53, %v1356_v55 }
 0x2ff   : > { %1516 = vst [vmem:[%s314_s21] sm:$0xff] %v1508_v56 }
 0x300   : > { %1517 = vst [vmem:[%s314_s21 + $0x8] sm:$0xff] %v1509_v57 }
 0x30a   : > { %v1424_v58 = vpop.f32.mrb[34].mxu0  ;;  %v1495_v59 = vpop.f32.mrb[34].mxu1 }
 0x30b   : > { %v1425_v61 = vadd.f32 %v1424_v58, %v1211_v31  ;;  %v1496_v62 = vadd.f32 %v1495_v59, %v1211_v31  ;;  %v1426_v2 = vpop.f32.mrb[35].mxu0  ;;  %v1497_v3 = vpop.f32.mrb[35].mxu1 }
 0x30c   : > { %v1427_v4 = vadd.f32 %v1426_v2, %v1211_v31  ;;  %v1498_v5 = vadd.f32 %v1497_v3, %v1211_v31 }
 0x30e   : > { %v1510_v7 = vcombine.low %v1425_v61, %v1427_v4  ;;  %v1511_v8 = vcombine.low %v1496_v62, %v1498_v5 }
 0x310   : > { %1518 = vst [vmem:[%s314_s21 + $0x10] sm:$0xff] %v1510_v7  ;;  %1519 = vst [vmem:[%s314_s21 + $0x18] sm:$0xff] %v1511_v8 }
 0x311   : > { %1901 = shalt.err (!%p1898_p4)
}
 0x312   : > { %s1902_s9 = scalar_lea.hbm %s2423_s27, 512  ;;  %s1906_s16 = scalar_lea.hbm %s2502_s11, 4096 }
 0x313   : > { %p1903_p6 = scmp.ne.s32.totalorder %s2423_s27, %s1902_s9  ;;  %p1907_p1 = scmp.lt.u32.totalorder %s2423_s27, %s2502_s11 }
 0x314   : > { %p1908_p3 = scmp.lt.u32.totalorder %s1906_s16, %s1902_s9  ;;  %p1910_p8 = scmp.lt.u32.totalorder %s1902_s9, %s2423_s27 }
 0x315   : > { %p1904_p7 = pnand %p1903_p6, %p2503_p9 }
 0x316   : > { %p1909_p5 = por %p1908_p3, %p1907_p1 }
 0x317   : > { %p1905_p10 = pneg %p1904_p7 }
 0x318   : > { %p1911_p12 = por %p1910_p8, %p1909_p5 }
 0x31a   : > { %p1912_p0 = pnand %p1911_p12, %p1905_p10 }
 0x31c   : > { %1915 = shalt.err (!%p1912_p0)
}
 0x31d   : > { %1775 = dma.vmem_to_hbm [thread:$0]  (%p2503_p9), %s2425_s24, 512, %s2423_s27, %s1521_s28  }
 0x31e PF: > { %s2504_s15 = sld [smem:[#allocation8_spill]]  ;;  %p1786_p11 = scmp.ge.s32.totalorder %s1986_s8, 2 }
 0x31f   : > { %p2505_p13 = scmp.ne.s32.totalorder %s2498_s20, 0 }
 0x321   : > { %p1782_p2 = pnand %p1786_p11, %p2505_p13 }
 0x324   : > { %s1549_s17 = sand.u32 1, %s2504_s15  }
 0x325   : > { %s1550_s23 = scalar_lea.sflag [#allocation4], %s1549_s17 }
 0x326   : > { %1953 = dma.done.wait (!%p1782_p2), %s1550_s23, 512  }
 0x327   : > { %1955 = vsyncadd (!%p1782_p2), %s1550_s23, 4294966784  ;;  %s23_s8 = sadd.s32 1, %s1986_s8   ;;  %s2506_s14 = sld [smem:[#allocation9_spill]] }
 0x328   : > { %p20_p4 = scmp.ge.s32.totalorder %s23_s8, 10   ;;  %s2507_s24 = smov %s1962_s25 }
 0x329   : > { %s2508_s25 = smov %s1966_s26  ;;  %s2509_s26 = smov %s2113_s22 }
 0x32a   : > { %s2510_s27 = smov %s1978_s29  ;;  %s2511_s28 = smov %s1982_s30 }
 0x32b   : > { %s2513_s30 = smov %s2519_s12  ;;  %22 = sbr.rel (!%p20_p4) target bundleno = 9 (0x9), region = 93 }
 0x32d   : > { %s2512_s29 = smov %s2506_s14 }
 0x332   :  { %1555 = vsyncpa [#allocation3], 1 }
 0x333   :  { %1557 = vsyncpa [#allocation3 + $0x1], 1 }
 0x334   :  { %1558 = vsyncpa [#allocation4], 1 }
 0x335   :  { %1560 = vsyncpa [#allocation4 + $0x1], 1 }

</bundles_post_ra>
